<compile_context>
chip_gen: v6e
topology: v6e:2x2x1
jax: 0.10.0
libtpu: 0.0.40
codegen_flags: <defaults>
</compile_context>

<pallas_src>
import functools

import jax
import jax.numpy as jnp
from jax import lax
from jax.experimental import pallas as pl
from jax.experimental.pallas import tpu as pltpu


# ---------------------------------------------------------------------------
# Fused kernel: t/p/g convs + attention + graph reasoning + scale + conv z + GroupNorm + residual
# ---------------------------------------------------------------------------
def fused_kernel(x_ref, wtpg_ref, m1_ref, b1_ref, m2_ref, b2_ref,
                 wzsum_ref, wzsq_ref, gwsel_ref, gsel_ref, beta_ref, o_ref,
                 *, planes, eps):
    xb = x_ref[0]                                                   # (Cin, HW) f32 (residual)

    # --- t / p / g 1x1 convs: single stacked bf16 MXU matmul, f32 accumulation ---------------
    tpg = jnp.dot(wtpg_ref[...], xb.astype(jnp.bfloat16),
                  preferred_element_type=jnp.float32)               # (3P, HW)
    t = tpg[:planes]
    p = tpg[planes:2 * planes]
    g = tpg[2 * planes:]

    # --- per-channel spatial dot product (groups == planes -> _c == 1) -----------------------
    att = jnp.sum(p * g, axis=-1, keepdims=True)                    # (P, 1)

    # --- graph reasoning on the (P,1) attention vector (tiny matmuls; BN scale pre-folded) ---
    z1 = jnp.dot(m1_ref[...], att, preferred_element_type=jnp.float32)   # conv_adj (* bn_adj scale)
    zr = jnp.maximum(z1 + b1_ref[...], 0.0) + att                        # bn_adj shift + relu + skip
    z2 = jnp.dot(m2_ref[...], zr, preferred_element_type=jnp.float32)    # conv_wg (* bn_wg scale)
    scale = jnp.maximum(z2 + b2_ref[...], 0.0)                           # bn_wg shift + relu -> (P,1)

    # --- scale * t; GroupNorm stats from (P,1) lane reductions (no big stats matmuls) --------
    ts = t * scale                                                  # (P, HW)
    s1 = jnp.sum(ts, axis=-1, keepdims=True)                        # (P, 1)
    s2 = jnp.sum(ts * ts, axis=-1, keepdims=True)                   # (P, 1)
    mean_g = wzsum_ref[...] * s1                                    # per-group mean of y = wz*ts
    ex2_g = wzsq_ref[...] * s2                                      # per-group E[y^2]
    var_g = jnp.maximum(ex2_g - mean_g * mean_g, 0.0)               # clamp: avoid rsqrt(neg)
    inv_std = lax.rsqrt(var_g + eps)                                # (P, 1)

    # --- grouped conv z + GroupNorm affine folded into one selection matmul + residual -------
    ts_n = (ts * inv_std).astype(jnp.bfloat16)                      # (P, HW)
    big = jnp.dot(gwsel_ref[...], ts_n,
                  preferred_element_type=jnp.float32)               # (Cin, HW): gamma*wz*inv_std*ts
    moff = jnp.dot(gsel_ref[...], mean_g * inv_std,
                   preferred_element_type=jnp.float32)              # (Cin, 1): gamma*mean*inv_std
    o_ref[0] = big + (beta_ref[...] - moff) + xb


# ---------------------------------------------------------------------------
# Wrapper
# ---------------------------------------------------------------------------
def channel_reason_forward(x, params, *, node_num):
    B, Cin, H, W = x.shape
    P = params["wt"].shape[0]          # planes
    groups = P                         # module default: groups == planes
    node_fea = P // node_num
    opg = Cin // groups                # out-channels per group of conv z == GroupNorm group size
    HW = H * W
    eps = 1e-5

    x3 = x.reshape(B, Cin, HW).astype(jnp.float32)

    # stacked t/p/g conv weights -> one bf16 MXU matmul
    w_tpg = jnp.concatenate([params["wt"], params["wp"], params["wg"]], axis=0).astype(jnp.bfloat16)

    # fold eval-mode BatchNorm into per-channel affine
    a_adj = params["bn_adj_gamma"] / jnp.sqrt(params["bn_adj_var"] + eps)
    b_adj = params["bn_adj_beta"] - params["bn_adj_mean"] * a_adj
    a_wg = params["bn_wg_gamma"] / jnp.sqrt(params["bn_wg_var"] + eps)
    b_wg = params["bn_wg_beta"] - params["bn_wg_mean"] * a_wg

    # Graph reasoning expressed in attention-channel space:
    #   att channel p  <-> (node n, fea f) with p = f*node_num + n   (split/cat in the module)
    #   scale channel q <-> (node n, fea f) with q = n*node_fea + f  (final reshape in the module)
    # BN scales a_adj / a_wg are folded into the row scaling of m1 / m2.
    m1 = jnp.kron(jnp.eye(node_fea, dtype=jnp.float32), params["wadj"]).astype(jnp.float32)  # (P, P)
    a1 = jnp.tile(a_adj, node_fea).reshape(P, 1)
    b1 = jnp.tile(b_adj, node_fea).reshape(P, 1)
    m1s = (a1 * m1).astype(jnp.float32)
    qi = jnp.arange(P)
    pi = jnp.arange(P)
    m2 = jnp.where((qi[:, None] // node_fea) == (pi[None, :] % node_num),
                   params["wwg"][qi[:, None] % node_fea, pi[None, :] // node_num],
                   0.0).astype(jnp.float32)                                                   # (P, P)
    a2 = jnp.tile(a_wg, node_num).reshape(P, 1)
    b2 = jnp.tile(b_wg, node_num).reshape(P, 1)
    m2s = (a2 * m2).astype(jnp.float32)

    # Grouped conv z (diagonal, y[c] = wz[c] * ts[c // opg]) folded with GroupNorm:
    wz = params["wz"]
    gamma = params["gn_gamma"]
    beta = params["gn_beta"]
    inv_n = 1.0 / float(opg * HW)
    wz_sum = params["wz"].reshape(P, opg).sum(axis=1).reshape(P, 1) * inv_n   # -> mean weight
    wz_sq = (wz * wz).reshape(P, opg).sum(axis=1).reshape(P, 1) * inv_n       # -> E[y^2] weight
    onehot = (jnp.arange(Cin)[:, None] // opg == jnp.arange(P)[None, :]).astype(jnp.float32)  # (Cin, P)
    gw_sel = (onehot * (gamma * wz)[:, None]).astype(jnp.bfloat16)   # expansion for the big term
    g_sel = (onehot * gamma[:, None]).astype(jnp.float32)            # expansion for the mean offset

    full2d = lambda shape: pl.BlockSpec(shape, lambda i: (0, 0))

    y3 = pl.pallas_call(
        functools.partial(fused_kernel, planes=P, eps=eps),
        grid=(B,),
        in_specs=[
            pl.BlockSpec((1, Cin, HW), lambda i: (i, 0, 0)),   # x (residual + matmul input)
            full2d((3 * P, Cin)),                              # stacked t/p/g weights (bf16)
            full2d((P, P)),                                    # m1s (bn_adj scale * conv_adj kron)
            full2d((P, 1)),                                    # b1  (bn_adj shift)
            full2d((P, P)),                                    # m2s (bn_wg scale * conv_wg + transposes)
            full2d((P, 1)),                                    # b2  (bn_wg shift)
            full2d((P, 1)),                                    # wz_sum * 1/N   (GN group stats)
            full2d((P, 1)),                                    # wz_sq  * 1/N
            full2d((Cin, P)),                                  # gw_sel (gamma*wz selection, bf16)
            full2d((Cin, P)),                                  # g_sel  (gamma selection)
            full2d((Cin, 1)),                                  # beta
        ],
        out_specs=pl.BlockSpec((1, Cin, HW), lambda i: (i, 0, 0)),
        out_shape=jax.ShapeDtypeStruct((B, Cin, HW), jnp.float32),
        compiler_params=pltpu.CompilerParams(dimension_semantics=("parallel",)),
    )(x3, w_tpg, m1s, b1, m2s, b2, wz_sum, wz_sq, gw_sel, g_sel, beta.reshape(Cin, 1))

    return y3.reshape(B, Cin, H, W)


# ---------------------------------------------------------------------------
# Deterministic parameter init (synthetic; matches the module's parameter shapes)
# ---------------------------------------------------------------------------
def init_params(key, inplanes, planes, node_num):
    node_fea = planes // node_num
    ks = jax.random.split(key, 12)
    n = lambda k, shape, s: s * jax.random.normal(k, shape, jnp.float32)
    return dict(
        wt=n(ks[0], (planes, inplanes), 0.1),       # Conv2d(inplanes, planes, 1)
        wp=n(ks[1], (planes, inplanes), 0.1),
        wg=n(ks[2], (planes, inplanes), 0.1),
        wz=n(ks[3], (inplanes,), 0.5),              # Conv2d(planes, inplanes, 1, groups=planes)
        wadj=n(ks[4], (node_num, node_num), 0.2),   # Conv1d(node_num, node_num, 1)
        wwg=n(ks[5], (node_fea, node_fea), 0.2),    # Conv1d(node_fea, node_fea, 1)
        bn_adj_gamma=1.0 + n(ks[6], (node_num,), 0.1),
        bn_adj_beta=n(ks[7], (node_num,), 0.1),
        bn_adj_mean=jnp.zeros((node_num,), jnp.float32),
        bn_adj_var=jnp.ones((node_num,), jnp.float32),
        bn_wg_gamma=1.0 + n(ks[8], (node_fea,), 0.1),
        bn_wg_beta=n(ks[9], (node_fea,), 0.1),
        bn_wg_mean=jnp.zeros((node_fea,), jnp.float32),
        bn_wg_var=jnp.ones((node_fea,), jnp.float32),
        gn_gamma=1.0 + n(ks[10], (inplanes,), 0.1),
        gn_beta=n(ks[11], (inplanes,), 0.1),
    )


# ---------------------------------------------------------------------------
# Pure-JAX reference (same eval-mode BN convention) for a sanity check
# ---------------------------------------------------------------------------
def reference_forward(x, params, node_num):
    B, Cin, H, W = x.shape
    P = params["wt"].shape[0]
    groups = P
    node_fea = P // node_num
    eps = 1e-5
    conv1x1 = lambda w, v: jnp.einsum("oc,bchw->bohw", w, v)
    t = conv1x1(params["wt"], x)
    p = conv1x1(params["wp"], x)
    g = conv1x1(params["wg"], x)
    att = jnp.sum(p.reshape(B, P, -1) * g.reshape(B, P, -1), axis=-1)     # (B, P)
    z_idt = att.reshape(B, node_fea, node_num).transpose(0, 2, 1)
    a_adj = params["bn_adj_gamma"] / jnp.sqrt(params["bn_adj_var"] + eps)
    b_adj = params["bn_adj_beta"] - params["bn_adj_mean"] * a_adj
    a_wg = params["bn_wg_gamma"] / jnp.sqrt(params["bn_wg_var"] + eps)
    b_wg = params["bn_wg_beta"] - params["bn_wg_mean"] * a_wg
    z = jnp.einsum("ij,bjf->bif", params["wadj"], z_idt)
    z = a_adj[None, :, None] * z + b_adj[None, :, None]
    z = jnp.maximum(z, 0.0) + z_idt
    zt = z.transpose(0, 2, 1)
    zt = jnp.einsum("ij,bjn->bin", params["wwg"], zt)
    zt = a_wg[None, :, None] * zt + b_wg[None, :, None]
    zt = jnp.maximum(zt, 0.0)
    z = zt.transpose(0, 2, 1)
    scale = z.reshape(B, P, 1, 1)
    xs = scale * t
    opg = Cin // groups
    y = params["wz"].reshape(1, Cin, 1, 1) * jnp.repeat(xs, opg, axis=1)
    gsize = Cin // groups
    yg = y.reshape(B, groups, gsize, H, W)
    mean = yg.mean(axis=(2, 3, 4), keepdims=True)
    var = yg.var(axis=(2, 3, 4), keepdims=True)
    yn = ((yg - mean) / jnp.sqrt(var + eps)).reshape(B, Cin, H, W)
    return yn * params["gn_gamma"][None, :, None, None] + params["gn_beta"][None, :, None, None] + x


if __name__ == "__main__":
    B, inplanes, planes, node_num, H, W = 2, 32, 16, 8, 16, 16
    key = jax.random.PRNGKey(0)
    kx, kp = jax.random.split(key)
    x = jax.random.normal(kx, (B, inplanes, H, W), jnp.float32)
    params = init_params(kp, inplanes, planes, node_num)

    # Round the big MXU operands to bf16-representable values so the f32 reference isolates
    # kernel correctness from the (intended) bf16 matmul policy.
    rnd = lambda a: a.astype(jnp.bfloat16).astype(jnp.float32)
    x = rnd(x)
    for name in ("wt", "wp", "wg"):
        params[name] = rnd(params[name])

    fwd = jax.jit(functools.partial(channel_reason_forward, node_num=node_num))
    out = jax.block_until_ready(fwd(x, params))

    ref = reference_forward(x, params, node_num)
    assert out.shape == x.shape
    assert bool(jnp.all(jnp.isfinite(out)))
    max_err = float(jnp.max(jnp.abs(out - ref)))
    mean_err = float(jnp.mean(jnp.abs(out - ref)))
    # remaining gap is the in-kernel bf16 rounding of the normalized-activation matmul
    assert max_err < 8e-2, f"max mismatch vs reference: {max_err}"
    assert mean_err < 1e-2, f"mean mismatch vs reference: {mean_err}"
    print("KERNEL_OK")
</pallas_src>

<mosaic_0001>
module attributes {stable_mosaic.version = 11 : i64} {
  func.func @fused_kernel(%arg0: i32, %arg1: memref<1x32x256xf32, #tpu.memory_space<vmem>>, %arg2: memref<48x32xbf16, #tpu.memory_space<vmem>>, %arg3: memref<16x16xf32, #tpu.memory_space<vmem>>, %arg4: memref<16x1xf32, #tpu.memory_space<vmem>>, %arg5: memref<16x16xf32, #tpu.memory_space<vmem>>, %arg6: memref<16x1xf32, #tpu.memory_space<vmem>>, %arg7: memref<16x1xf32, #tpu.memory_space<vmem>>, %arg8: memref<16x1xf32, #tpu.memory_space<vmem>>, %arg9: memref<32x16xbf16, #tpu.memory_space<vmem>>, %arg10: memref<32x16xf32, #tpu.memory_space<vmem>>, %arg11: memref<32x1xf32, #tpu.memory_space<vmem>>, %arg12: memref<1x32x256xf32, #tpu.memory_space<vmem>>) attributes {dimension_semantics = [#tpu.dimension_semantics<parallel>], iteration_bounds = array<i64: 2>, scalar_prefetch = 0 : i64, scratch_operands = 0 : i64, tpu.core_type = #tpu.core_type<tc>, window_params = [{transform_indices = @transform_0, window_bounds = array<i64: 1, 32, 256>}, {pipeline_mode = #tpu.pipeline_mode<synchronous>, transform_indices = @transform_1, window_bounds = array<i64: 48, 32>}, {pipeline_mode = #tpu.pipeline_mode<synchronous>, transform_indices = @transform_2, window_bounds = array<i64: 16, 16>}, {pipeline_mode = #tpu.pipeline_mode<synchronous>, transform_indices = @transform_3, window_bounds = array<i64: 16, 1>}, {pipeline_mode = #tpu.pipeline_mode<synchronous>, transform_indices = @transform_4, window_bounds = array<i64: 16, 16>}, {pipeline_mode = #tpu.pipeline_mode<synchronous>, transform_indices = @transform_5, window_bounds = array<i64: 16, 1>}, {pipeline_mode = #tpu.pipeline_mode<synchronous>, transform_indices = @transform_6, window_bounds = array<i64: 16, 1>}, {pipeline_mode = #tpu.pipeline_mode<synchronous>, transform_indices = @transform_7, window_bounds = array<i64: 16, 1>}, {pipeline_mode = #tpu.pipeline_mode<synchronous>, transform_indices = @transform_8, window_bounds = array<i64: 32, 16>}, {pipeline_mode = #tpu.pipeline_mode<synchronous>, transform_indices = @transform_9, window_bounds = array<i64: 32, 16>}, {pipeline_mode = #tpu.pipeline_mode<synchronous>, transform_indices = @transform_10, window_bounds = array<i64: 32, 1>}, {transform_indices = @transform_11, window_bounds = array<i64: 1, 32, 256>}]} {
    %c0 = arith.constant 0 : index
    %c0_0 = arith.constant 0 : index
    %c0_1 = arith.constant 0 : index
    %0 = vector.load %arg1[%c0, %c0_0, %c0_1] : memref<1x32x256xf32, #tpu.memory_space<vmem>>, vector<1x32x256xf32>
    %1 = vector.shape_cast %0 : vector<1x32x256xf32> to vector<32x256xf32>
    %c0_2 = arith.constant 0 : index
    %c0_3 = arith.constant 0 : index
    %2 = vector.load %arg2[%c0_2, %c0_3] : memref<48x32xbf16, #tpu.memory_space<vmem>>, vector<48x32xbf16>
    %3 = arith.truncf %1 : vector<32x256xf32> to vector<32x256xbf16>
    %cst = arith.constant dense<0.000000e+00> : vector<48x256xf32>
    %4 = tpu.matmul %2, %3, %cst {dimension_numbers = #tpu.dot_dimension_numbers<[1], [0], [0], [1], [0, 0, 1, 1], [], []>} : vector<48x32xbf16>, vector<32x256xbf16>, vector<48x256xf32> -> vector<48x256xf32>
    %5 = vector.extract_strided_slice %4 {offsets = [0, 0], sizes = [16, 256], strides = [1, 1]} : vector<48x256xf32> to vector<16x256xf32>
    %6 = vector.extract_strided_slice %4 {offsets = [16, 0], sizes = [16, 256], strides = [1, 1]} : vector<48x256xf32> to vector<16x256xf32>
    %7 = vector.extract_strided_slice %4 {offsets = [32, 0], sizes = [16, 256], strides = [1, 1]} : vector<48x256xf32> to vector<16x256xf32>
    %8 = arith.mulf %6, %7 : vector<16x256xf32>
    %cst_4 = arith.constant dense<0.000000e+00> : vector<16xf32>
    %9 = vector.multi_reduction <add>, %8, %cst_4 [1] : vector<16x256xf32> to vector<16xf32>
    %10 = vector.shape_cast %9 : vector<16xf32> to vector<16x1xf32>
    %c0_5 = arith.constant 0 : index
    %c0_6 = arith.constant 0 : index
    %11 = vector.load %arg3[%c0_5, %c0_6] : memref<16x16xf32, #tpu.memory_space<vmem>>, vector<16x16xf32>
    %cst_7 = arith.constant dense<0.000000e+00> : vector<16x1xf32>
    %12 = tpu.matmul %11, %10, %cst_7 {dimension_numbers = #tpu.dot_dimension_numbers<[1], [0], [0], [1], [0, 0, 1, 1], [], []>} : vector<16x16xf32>, vector<16x1xf32>, vector<16x1xf32> -> vector<16x1xf32>
    %c0_8 = arith.constant 0 : index
    %c0_9 = arith.constant 0 : index
    %13 = vector.load %arg4[%c0_8, %c0_9] : memref<16x1xf32, #tpu.memory_space<vmem>>, vector<16x1xf32>
    %14 = arith.addf %12, %13 : vector<16x1xf32>
    %cst_10 = arith.constant 0.000000e+00 : f32
    %15 = vector.broadcast %cst_10 : f32 to vector<16x1xf32>
    %16 = arith.maximumf %14, %15 : vector<16x1xf32>
    %17 = arith.addf %16, %10 : vector<16x1xf32>
    %c0_11 = arith.constant 0 : index
    %c0_12 = arith.constant 0 : index
    %18 = vector.load %arg5[%c0_11, %c0_12] : memref<16x16xf32, #tpu.memory_space<vmem>>, vector<16x16xf32>
    %cst_13 = arith.constant dense<0.000000e+00> : vector<16x1xf32>
    %19 = tpu.matmul %18, %17, %cst_13 {dimension_numbers = #tpu.dot_dimension_numbers<[1], [0], [0], [1], [0, 0, 1, 1], [], []>} : vector<16x16xf32>, vector<16x1xf32>, vector<16x1xf32> -> vector<16x1xf32>
    %c0_14 = arith.constant 0 : index
    %c0_15 = arith.constant 0 : index
    %20 = vector.load %arg6[%c0_14, %c0_15] : memref<16x1xf32, #tpu.memory_space<vmem>>, vector<16x1xf32>
    %21 = arith.addf %19, %20 : vector<16x1xf32>
    %cst_16 = arith.constant 0.000000e+00 : f32
    %22 = vector.broadcast %cst_16 : f32 to vector<16x1xf32>
    %23 = arith.maximumf %21, %22 : vector<16x1xf32>
    %24 = vector.broadcast %23 : vector<16x1xf32> to vector<16x256xf32>
    %25 = arith.mulf %5, %24 : vector<16x256xf32>
    %cst_17 = arith.constant dense<0.000000e+00> : vector<16xf32>
    %26 = vector.multi_reduction <add>, %25, %cst_17 [1] : vector<16x256xf32> to vector<16xf32>
    %27 = vector.shape_cast %26 : vector<16xf32> to vector<16x1xf32>
    %28 = arith.mulf %25, %25 : vector<16x256xf32>
    %cst_18 = arith.constant dense<0.000000e+00> : vector<16xf32>
    %29 = vector.multi_reduction <add>, %28, %cst_18 [1] : vector<16x256xf32> to vector<16xf32>
    %30 = vector.shape_cast %29 : vector<16xf32> to vector<16x1xf32>
    %c0_19 = arith.constant 0 : index
    %c0_20 = arith.constant 0 : index
    %31 = vector.load %arg7[%c0_19, %c0_20] : memref<16x1xf32, #tpu.memory_space<vmem>>, vector<16x1xf32>
    %32 = arith.mulf %31, %27 : vector<16x1xf32>
    %c0_21 = arith.constant 0 : index
    %c0_22 = arith.constant 0 : index
    %33 = vector.load %arg8[%c0_21, %c0_22] : memref<16x1xf32, #tpu.memory_space<vmem>>, vector<16x1xf32>
    %34 = arith.mulf %33, %30 : vector<16x1xf32>
    %35 = arith.mulf %32, %32 : vector<16x1xf32>
    %36 = arith.subf %34, %35 : vector<16x1xf32>
    %cst_23 = arith.constant 0.000000e+00 : f32
    %37 = vector.broadcast %cst_23 : f32 to vector<16x1xf32>
    %38 = arith.maximumf %36, %37 : vector<16x1xf32>
    %cst_24 = arith.constant 9.99999974E-6 : f32
    %39 = vector.broadcast %cst_24 : f32 to vector<16x1xf32>
    %40 = arith.addf %38, %39 : vector<16x1xf32>
    %41 = math.rsqrt %40 : vector<16x1xf32>
    %42 = vector.broadcast %41 : vector<16x1xf32> to vector<16x256xf32>
    %43 = arith.mulf %25, %42 : vector<16x256xf32>
    %44 = arith.truncf %43 : vector<16x256xf32> to vector<16x256xbf16>
    %c0_25 = arith.constant 0 : index
    %c0_26 = arith.constant 0 : index
    %45 = vector.load %arg9[%c0_25, %c0_26] : memref<32x16xbf16, #tpu.memory_space<vmem>>, vector<32x16xbf16>
    %cst_27 = arith.constant dense<0.000000e+00> : vector<32x256xf32>
    %46 = tpu.matmul %45, %44, %cst_27 {dimension_numbers = #tpu.dot_dimension_numbers<[1], [0], [0], [1], [0, 0, 1, 1], [], []>} : vector<32x16xbf16>, vector<16x256xbf16>, vector<32x256xf32> -> vector<32x256xf32>
    %c0_28 = arith.constant 0 : index
    %c0_29 = arith.constant 0 : index
    %47 = vector.load %arg10[%c0_28, %c0_29] : memref<32x16xf32, #tpu.memory_space<vmem>>, vector<32x16xf32>
    %48 = arith.mulf %32, %41 : vector<16x1xf32>
    %cst_30 = arith.constant dense<0.000000e+00> : vector<32x1xf32>
    %49 = tpu.matmul %47, %48, %cst_30 {dimension_numbers = #tpu.dot_dimension_numbers<[1], [0], [0], [1], [0, 0, 1, 1], [], []>} : vector<32x16xf32>, vector<16x1xf32>, vector<32x1xf32> -> vector<32x1xf32>
    %c0_31 = arith.constant 0 : index
    %c0_32 = arith.constant 0 : index
    %50 = vector.load %arg11[%c0_31, %c0_32] : memref<32x1xf32, #tpu.memory_space<vmem>>, vector<32x1xf32>
    %51 = arith.subf %50, %49 : vector<32x1xf32>
    %52 = vector.broadcast %51 : vector<32x1xf32> to vector<32x256xf32>
    %53 = arith.addf %46, %52 : vector<32x256xf32>
    %54 = arith.addf %53, %1 : vector<32x256xf32>
    %c0_33 = arith.constant 0 : index
    %c0_34 = arith.constant 0 : index
    %c0_35 = arith.constant 0 : index
    %55 = vector.load %arg12[%c0_33, %c0_34, %c0_35] : memref<1x32x256xf32, #tpu.memory_space<vmem>>, vector<1x32x256xf32>
    %56 = vector.shape_cast %55 : vector<1x32x256xf32> to vector<32x256xf32>
    %57 = vector.shape_cast %54 : vector<32x256xf32> to vector<1x32x256xf32>
    tpu.vector_store %arg12[%c0_33, %c0_34, %c0_35], %57 {strides = array<i32>} : memref<1x32x256xf32, #tpu.memory_space<vmem>>, vector<1x32x256xf32>,
    return
  }
  func.func @transform_0(%arg0: i32) -> (i32, i32, i32) {
    %c0_i32 = arith.constant 0 : i32
    %c0_i32_0 = arith.constant 0 : i32
    %c0_i32_1 = arith.constant 0 : i32
    return %arg0, %c0_i32, %c0_i32_0 : i32, i32, i32
  }
  func.func @transform_1(%arg0: i32) -> (i32, i32) {
    %c0_i32 = arith.constant 0 : i32
    %c0_i32_0 = arith.constant 0 : i32
    %c0_i32_1 = arith.constant 0 : i32
    return %c0_i32, %c0_i32_0 : i32, i32
  }
  func.func @transform_2(%arg0: i32) -> (i32, i32) {
    %c0_i32 = arith.constant 0 : i32
    %c0_i32_0 = arith.constant 0 : i32
    %c0_i32_1 = arith.constant 0 : i32
    return %c0_i32, %c0_i32_0 : i32, i32
  }
  func.func @transform_3(%arg0: i32) -> (i32, i32) {
    %c0_i32 = arith.constant 0 : i32
    %c0_i32_0 = arith.constant 0 : i32
    %c0_i32_1 = arith.constant 0 : i32
    return %c0_i32, %c0_i32_0 : i32, i32
  }
  func.func @transform_4(%arg0: i32) -> (i32, i32) {
    %c0_i32 = arith.constant 0 : i32
    %c0_i32_0 = arith.constant 0 : i32
    %c0_i32_1 = arith.constant 0 : i32
    return %c0_i32, %c0_i32_0 : i32, i32
  }
  func.func @transform_5(%arg0: i32) -> (i32, i32) {
    %c0_i32 = arith.constant 0 : i32
    %c0_i32_0 = arith.constant 0 : i32
    %c0_i32_1 = arith.constant 0 : i32
    return %c0_i32, %c0_i32_0 : i32, i32
  }
  func.func @transform_6(%arg0: i32) -> (i32, i32) {
    %c0_i32 = arith.constant 0 : i32
    %c0_i32_0 = arith.constant 0 : i32
    %c0_i32_1 = arith.constant 0 : i32
    return %c0_i32, %c0_i32_0 : i32, i32
  }
  func.func @transform_7(%arg0: i32) -> (i32, i32) {
    %c0_i32 = arith.constant 0 : i32
    %c0_i32_0 = arith.constant 0 : i32
    %c0_i32_1 = arith.constant 0 : i32
    return %c0_i32, %c0_i32_0 : i32, i32
  }
  func.func @transform_8(%arg0: i32) -> (i32, i32) {
    %c0_i32 = arith.constant 0 : i32
    %c0_i32_0 = arith.constant 0 : i32
    %c0_i32_1 = arith.constant 0 : i32
    return %c0_i32, %c0_i32_0 : i32, i32
  }
  func.func @transform_9(%arg0: i32) -> (i32, i32) {
    %c0_i32 = arith.constant 0 : i32
    %c0_i32_0 = arith.constant 0 : i32
    %c0_i32_1 = arith.constant 0 : i32
    return %c0_i32, %c0_i32_0 : i32, i32
  }
  func.func @transform_10(%arg0: i32) -> (i32, i32) {
    %c0_i32 = arith.constant 0 : i32
    %c0_i32_0 = arith.constant 0 : i32
    %c0_i32_1 = arith.constant 0 : i32
    return %c0_i32, %c0_i32_0 : i32, i32
  }
  func.func @transform_11(%arg0: i32) -> (i32, i32, i32) {
    %c0_i32 = arith.constant 0 : i32
    %c0_i32_0 = arith.constant 0 : i32
    %c0_i32_1 = arith.constant 0 : i32
    return %arg0, %c0_i32, %c0_i32_0 : i32, i32, i32
  }
}

</mosaic_0001>

<bundles_post_ra>
// kernel: mul.47
= control target key start
LH: loop header
LB: loop body
LE: loop exit
PB: predicated region body
PF: predicated region fallthrough
CT: control target
= control target key end

     0   :  { %s34_s0 = inlined_call_operand.vmem [shape: f32[32], index: 0, kind: input, shape index: {}, may-alias: {0,1}]   ;;  %s35_s1 = inlined_call_operand.vmem [shape: f32[32], index: 1, kind: input, shape index: {}, may-alias: {0,1}]   ;;  %s36_s2 = inlined_call_operand.vmem [shape: f32[32], index: 2, kind: output, shape index: {}]  }
   0x1   :  { %v3_v0 = vld [vmem:[%s34_s0] sm:$0x1] }
   0x2   :  { %v4_v1 = vld [vmem:[%s35_s1] sm:$0x1] }
   0x3   :  { %v7_v2 = vmul.f32 %v4_v1, %v3_v0 }
   0x5   :  { %9 = vst [vmem:[%s36_s2] sm:$0x1] %v7_v2 }

// kernel: mul.49
= control target key start
LH: loop header
LB: loop body
LE: loop exit
PB: predicated region body
PF: predicated region fallthrough
CT: control target
= control target key end

     0   :  { %v12_v3 = vmov 0.0   ;;  %s37_s0 = inlined_call_operand.vmem [shape: f32[32], index: 0, kind: input, shape index: {}]   ;;  %s38_s1 = inlined_call_operand.vmem [shape: f32[32], index: 1, kind: input, shape index: {}]   ;;  %s39_s2 = inlined_call_operand.vmem [shape: bf16[32], index: 2, kind: output, shape index: {}]  }
   0x1   :  { %v3_v0 = vld [vmem:[%s37_s0] sm:$0x1] }
   0x2   :  { %v4_v1 = vld [vmem:[%s38_s1] sm:$0x1] }
   0x3   :  { %v7_v2 = vmul.f32 %v4_v1, %v3_v0 }
   0x5   :  { %v9_v4 = vpack.c.bf16 %v12_v3, %v7_v2 }
   0x7   :  { %10 = vst [vmem:[%s39_s2] sm:$0x1] %v9_v4 }

// kernel: tile.28
= control target key start
LH: loop header
LB: loop body
LE: loop exit
PB: predicated region body
PF: predicated region fallthrough
CT: control target
= control target key end

     0   :  { %s22_s0 = inlined_call_operand.vmem [shape: f32[8], index: 0, kind: input, shape index: {}]   ;;  %s23_s1 = inlined_call_operand.vmem [shape: f32[2,8], index: 1, kind: output, shape index: {}]  }
   0x1   :  { %v4_v0 = vld [vmem:[%s22_s0] ss:$0 sm:$0xff] }
   0x2   :  { %5 = vst [vmem:[%s23_s1] sm:$0x3] %v4_v0 }

// kernel: mul.39
= control target key start
LH: loop header
LB: loop body
LE: loop exit
PB: predicated region body
PF: predicated region fallthrough
CT: control target
= control target key end

     0   :  { %vm8_vm0 = vcmask 64512   ;;  %vm14_vm1 = vcmask 130112   ;;  %s42_s0 = inlined_call_operand.vmem [shape: f32[2,8], index: 0, kind: input, shape index: {}]   ;;  %s43_s1 = inlined_call_operand.vmem [shape: f32[16], index: 1, kind: output, shape index: {}]  }
   0x1   :  { %v5_v0 = vld [vmem:[%s42_s0] sm:$0x3]  ;;  %s25_s0 = smov 8  }
   0x2   :  { %6 = vst [vmem:[#allocation1] sm:$0x3] %v5_v0 }
   0x9   :  { %v11_v1 = vld [vmem:[#allocation1 + $0x1] sm:$0x1]   ;;  %v7_v2 = vld [vmem:[#allocation1] sm:$0x1]  }
   0xa   :  { %12 = vrot.lane.b32.xlu0 %v11_v1, %s25_s0  ;;  %9 = vst.msk [vmem:[#allocation0] sm:$0x1] %vm8_vm0, %v7_v2  }
  0x7c   :  { %v13_v3 = vpop.permute.xlu0 %12  }
  0x7d   :  { %15 = vst.msk [vmem:[#allocation0] sm:$0x1] %vm14_vm1, %v13_v3  }
  0x84   :  { %v20_v4 = vld [vmem:[#allocation0] sm:$0x1] }
  0x85   :  { %23 = vst [vmem:[%s43_s1] sm:$0x1] %v20_v4 }

// kernel: tile.38
= control target key start
LH: loop header
LB: loop body
LE: loop exit
PB: predicated region body
PF: predicated region fallthrough
CT: control target
= control target key end

     0   :  { %s22_s0 = inlined_call_operand.vmem [shape: f32[2], index: 0, kind: input, shape index: {}]   ;;  %s23_s1 = inlined_call_operand.vmem [shape: f32[8,2], index: 1, kind: output, shape index: {}]  }
   0x1   :  { %v4_v0 = vld [vmem:[%s22_s0] ss:$0 sm:$0xff] }
   0x2   :  { %5 = vst [vmem:[%s23_s1] sm:$0xff] %v4_v0 }

// kernel: tile.1
= control target key start
LH: loop header
LB: loop body
LE: loop exit
PB: predicated region body
PF: predicated region fallthrough
CT: control target
= control target key end

     0   :  { %vm3_vm0 = vcmask 7168   ;;  %s13_s9 = smov 127   ;;  %s33_s0 = inlined_call_operand.vmem [shape: f32[8,2], index: 0, kind: input, shape index: {}]   ;;  %s34_s1 = inlined_call_operand.vmem [shape: f32[16,1], index: 1, kind: output, shape index: {}]  }
   0x1   :  { %v2_v0 = vld [vmem:[%s33_s0] sm:$0xff]  }
   0x2   :  { %4 = vst.msk [vmem:[%s34_s1] ss:$2 sm:$0xff] %vm3_vm0, %v2_v0   ;;  %6 = vrot.lane.b32.xlu0 %v2_v0, %s13_s9 }
  0x74   :  { %v7_v1 = vpop.permute.xlu0 %6  }
  0x75   :  { %11 = vst.msk [vmem:[%s34_s1 + $0x1] ss:$2 sm:$0xff] %vm3_vm0, %v7_v1  }

// kernel: mul.43
= control target key start
LH: loop header
LB: loop body
LE: loop exit
PB: predicated region body
PF: predicated region fallthrough
CT: control target
= control target key end

     0   :  { %s69_s10 = smov 14   ;;  %s70_s11 = smov 10   ;;  %vm3_vm0 = vcmask 15360   ;;  %vm9_vm1 = vcmask 130160   ;;  %vm15_vm2 = vcmask 113760   ;;  %vm21_vm3 = vcmask 97360   ;;  %s113_s0 = inlined_call_operand.vmem [shape: f32[8,2], index: 0, kind: input, shape index: {}]   ;;  %s114_s1 = inlined_call_operand.vmem [shape: f32[16], index: 1, kind: output, shape index: {}]  }
   0x1   :  { %v55_v0 = vld [vmem:[%s113_s0 + $0x7] sm:$0x1]   ;;  %v57_v1 = vld [vmem:[%s113_s0 + $0x5] sm:$0x1]   ;;  %v56_v2 = vld [vmem:[%s113_s0 + $0x6] sm:$0x1]  }
   0x2   :  { %7 = vrot.lane.b32.xlu0 %v55_v0, %s69_s10  ;;  %19 = vrot.lane.b32.xlu1 %v57_v1, %s70_s11  ;;  %v58_v3 = vld [vmem:[%s113_s0 + $0x4] sm:$0x1]   ;;  %v2_v4 = vld [vmem:[%s113_s0] sm:$0x1]   ;;  %s71_s18 = smov 12   ;;  %s72_s19 = smov 8  }
   0x3   :  { %4 = vst.msk [vmem:[#allocation0] sm:$0x1] %vm3_vm0, %v2_v4   ;;  %v59_v5 = vld [vmem:[%s113_s0 + $0x3] sm:$0x1]   ;;  %v60_v6 = vld [vmem:[%s113_s0 + $0x2] sm:$0x1]  }
   0x4   :  { %s73_s24 = smov 6   ;;  %s74_s25 = smov 4   ;;  %v61_v7 = vld [vmem:[%s113_s0 + $0x1] sm:$0x1]   ;;  %vm27_vm4 = vcmask 80960   ;;  %vm33_vm5 = vcmask 64560  }
   0x5   :  { %s75_s0 = smov 2   ;;  %vm39_vm6 = vcmask 48160   ;;  %vm45_vm7 = vcmask 31760  }
   0x6   :  { %13 = vrot.lane.b32.xlu0 %v56_v2, %s71_s18  ;;  %25 = vrot.lane.b32.xlu1 %v58_v3, %s72_s19 }
   0xa   :  { %31 = vrot.lane.b32.xlu0 %v59_v5, %s73_s24  ;;  %37 = vrot.lane.b32.xlu1 %v60_v6, %s74_s25 }
   0xe   :  { %43 = vrot.lane.b32.xlu0 %v61_v7, %s75_s0 }
  0x74   :  { %v8_v8 = vpop.permute.xlu0 %7   ;;  %v20_v9 = vpop.permute.xlu1 %19  }
  0x75   :  { %10 = vst.msk [vmem:[#allocation0] sm:$0x1] %vm9_vm1, %v8_v8  }
  0x78   :  { %v14_v10 = vpop.permute.xlu0 %13   ;;  %v26_v11 = vpop.permute.xlu1 %25  }
  0x79   :  { %16 = vst.msk [vmem:[#allocation0] sm:$0x1] %vm15_vm2, %v14_v10  }
  0x7a   :  { %22 = vst.msk [vmem:[#allocation0] sm:$0x1] %vm21_vm3, %v20_v9  }
  0x7b   :  { %28 = vst.msk [vmem:[#allocation0] sm:$0x1] %vm27_vm4, %v26_v11  }
  0x7c   :  { %v32_v12 = vpop.permute.xlu0 %31   ;;  %v38_v13 = vpop.permute.xlu1 %37  }
  0x7d   :  { %34 = vst.msk [vmem:[#allocation0] sm:$0x1] %vm33_vm5, %v32_v12  }
  0x7e   :  { %40 = vst.msk [vmem:[#allocation0] sm:$0x1] %vm39_vm6, %v38_v13  }
  0x80   :  { %v44_v14 = vpop.permute.xlu0 %43  }
  0x81   :  { %46 = vst.msk [vmem:[#allocation0] sm:$0x1] %vm45_vm7, %v44_v14  }
  0x88   :  { %v51_v15 = vld [vmem:[#allocation0] sm:$0x1] }
  0x89   :  { %54 = vst [vmem:[%s114_s1] sm:$0x1] %v51_v15 }

// kernel: tile.0
= control target key start
LH: loop header
LB: loop body
LE: loop exit
PB: predicated region body
PF: predicated region fallthrough
CT: control target
= control target key end

     0   :  { %s67_s8 = smov 125   ;;  %vm8_vm0 = vcmask 7168   ;;  %s68_s11 = smov 126   ;;  %s118_s0 = inlined_call_operand.vmem [shape: f32[2,8], index: 0, kind: input, shape index: {}]   ;;  %s119_s1 = inlined_call_operand.vmem [shape: f32[16,1], index: 1, kind: output, shape index: {}]  }
   0x1   :  { %v5_v0 = vld [vmem:[%s118_s0] sm:$0x3]  ;;  %s66_s0 = smov 127   ;;  %s69_s12 = smov 124  }
   0x2   :  { %6 = vst [vmem:[#allocation0] sm:$0x3] %v5_v0  ;;  %s70_s13 = smov 123   ;;  %s71_s14 = smov 122  }
   0x3   :  { %s72_s15 = smov 121  }
   0x9   :  { %v10_v1 = vld [vmem:[#allocation0] sm:$0x3]  }
   0xa   :  { %v22_v2 = vld [vmem:[#allocation0] sm:$0x3]   ;;  %11 = vrot.lane.b32.xlu0 %v10_v1, %s66_s0 }
   0xb   :  { %23 = vrot.lane.b32.xlu1 %v22_v2, %s67_s8  ;;  %v16_v3 = vld [vmem:[#allocation0] sm:$0x3]  }
   0xc   :  { %v28_v4 = vld [vmem:[#allocation0] sm:$0x3]  }
   0xd   :  { %v7_v5 = vld [vmem:[#allocation0] sm:$0x3]  }
   0xe   :  { %9 = vst.msk [vmem:[%s119_s1] ss:$8 sm:$0x3] %vm8_vm0, %v7_v5   ;;  %17 = vrot.lane.b32.xlu0 %v16_v3, %s68_s11  ;;  %v34_v6 = vld [vmem:[#allocation0] sm:$0x3]  }
   0xf   :  { %29 = vrot.lane.b32.xlu1 %v28_v4, %s69_s12  ;;  %v40_v7 = vld [vmem:[#allocation0] sm:$0x3]  }
  0x10   :  { %v46_v8 = vld [vmem:[#allocation0] sm:$0x3]  }
  0x12   :  { %35 = vrot.lane.b32.xlu0 %v34_v6, %s70_s13 }
  0x13   :  { %41 = vrot.lane.b32.xlu1 %v40_v7, %s71_s14 }
  0x16   :  { %47 = vrot.lane.b32.xlu0 %v46_v8, %s72_s15 }
  0x7c   :  { %v12_v9 = vpop.permute.xlu0 %11  }
  0x7d   :  { %v24_v10 = vpop.permute.xlu1 %23   ;;  %52 = vst.msk [vmem:[%s119_s1 + $0x1] ss:$8 sm:$0x3] %vm8_vm0, %v12_v9  }
  0x7e   :  { %54 = vst.msk [vmem:[%s119_s1 + $0x3] ss:$8 sm:$0x3] %vm8_vm0, %v24_v10  }
  0x80   :  { %v18_v11 = vpop.permute.xlu0 %17  }
  0x81   :  { %v30_v12 = vpop.permute.xlu1 %29   ;;  %53 = vst.msk [vmem:[%s119_s1 + $0x2] ss:$8 sm:$0x3] %vm8_vm0, %v18_v11  }
  0x82   :  { %55 = vst.msk [vmem:[%s119_s1 + $0x4] ss:$8 sm:$0x3] %vm8_vm0, %v30_v12  }
  0x84   :  { %v36_v13 = vpop.permute.xlu0 %35  }
  0x85   :  { %v42_v14 = vpop.permute.xlu1 %41   ;;  %56 = vst.msk [vmem:[%s119_s1 + $0x5] ss:$8 sm:$0x3] %vm8_vm0, %v36_v13  }
  0x86   :  { %57 = vst.msk [vmem:[%s119_s1 + $0x6] ss:$8 sm:$0x3] %vm8_vm0, %v42_v14  }
  0x88   :  { %v48_v15 = vpop.permute.xlu0 %47  }
  0x89   :  { %58 = vst.msk [vmem:[%s119_s1 + $0x7] ss:$8 sm:$0x3] %vm8_vm0, %v48_v15  }

// kernel: channel_reason_forward.1
= control target key start
LH: loop header
LB: loop body
LE: loop exit
PB: predicated region body
PF: predicated region fallthrough
CT: control target
= control target key end

     0   :  { %s1178_s17 = smov 0   ;;  %s1342_s0 = inlined_call_operand.vmem [shape: f32[2,32,256], index: 0, kind: input, shape index: {}]   ;;  %s1343_s1 = inlined_call_operand.vmem [shape: bf16[48,32], index: 1, kind: input, shape index: {}]   ;;  %s1344_s2 = inlined_call_operand.vmem [shape: f32[16,16], index: 2, kind: input, shape index: {}]   ;;  %s1345_s3 = inlined_call_operand.vmem [shape: f32[16,1], index: 3, kind: input, shape index: {}]   ;;  %s1346_s4 = inlined_call_operand.vmem [shape: f32[16,16], index: 4, kind: input, shape index: {}]   ;;  %s1347_s5 = inlined_call_operand.vmem [shape: f32[16,1], index: 5, kind: input, shape index: {}]   ;;  %s1348_s6 = inlined_call_operand.vmem [shape: f32[16,1], index: 6, kind: input, shape index: {}]   ;;  %s1349_s7 = inlined_call_operand.vmem [shape: f32[16,1], index: 7, kind: input, shape index: {}]   ;;  %s1350_s8 = inlined_call_operand.vmem [shape: bf16[32,16], index: 8, kind: input, shape index: {}]   ;;  %s1351_s9 = inlined_call_operand.vmem [shape: f32[32,16], index: 9, kind: input, shape index: {}]   ;;  %s1352_s10 = inlined_call_operand.vmem [shape: f32[32,1], index: 10, kind: input, shape index: {}]   ;;  %s1353_s11 = inlined_call_operand.vmem [shape: f32[2,32,256], index: 11, kind: output, shape index: {}]  }
   0x1 LB: > { %s1020_s18 = sadd.s32 4294967295, %s1115_s17   ;;  %p1024_p0 = scmp.ge.s32.totalorder %s1115_s17, 1  ;;  %s1115_s17 = sphi %s1178_s17, %s21_s17  }
   0x2   : > { %p337_p1 = scmp.lt.s32.totalorder %s1115_s17, 3 }
   0x4   : > { %p338_p2 = pnand %p1024_p0, %p337_p1 }
   0x5   : > { %p377_p3 = scmp.lt.s32.totalorder (!%p338_p2), %s1020_s18, 1 }
   0x6   : > { %341 = sbr.rel (%p338_p2) target bundleno = 1430 (0x596), region = 64 }
   0xb   : > { %v1117_v0 = vmov 0   ;;  %s1355_s18 = smov (!%p377_p3, %s1020_s18), 1  ;;  %v1100_v13 = vld [vmem:[%s1343_s1] sm:$0xff]   ;;  %vm421_vm0 = vcmask 261120   ;;  %v1101_v14 = vld [vmem:[%s1343_s1 + $0x8] sm:$0xff]   ;;  %v1102_v15 = vld [vmem:[%s1343_s1 + $0x10] sm:$0xff]  }
   0xc   : > { %463 = vmatprep.mubr.bf16.mxu0 %v1117_v0  ;;  %1098 = vset.pattern.permute.xlu1 %v1117_v0  ;;  %s1049_s19 = sshll.u32 %s1355_s18, 6  ;;  %v504_v34 = vld [vmem:[%s1344_s2] sm:$0xff]  ;;  %vm508_vm1 = vcmask 130048   ;;  %v505_v37 = vld [vmem:[%s1344_s2 + $0x8] sm:$0xff] }
   0xd   : > { %1099 = vset.pattern.permute.xlu0 %v1117_v0  ;;  %s381_s22 = scalar_lea.vmem %s1342_s0, %s1049_s19  ;;  %1069 = vmatprep.mubr.msk.f32.mxu1 %vm508_vm1, %v504_v34  ;;  %v594_v38 = vld [vmem:[%s1346_s4] sm:$0xff]  ;;  %v507_v39 = vld [vmem:[%s1345_s3 + $0x8] sm:$0xff]  ;;  %s1321_s27 = scalar_lea.vmem %s1353_s11, %s1049_s19 }
   0xe   : > { %v1197_v1 = vld [vmem:[%s381_s22 + $0x28] sm:$0xff]  ;;  %v1199_v2 = vld [vmem:[%s381_s22 + $0x38] sm:$0xff]  ;;  %v1201_v3 = vld [vmem:[%s381_s22 + $0x20] sm:$0xff] }
   0xf   : > { %v405_v4 = vpack.c.bf16 %v1199_v2, %v1197_v1  ;;  %v1205_v5 = vld [vmem:[%s381_s22 + $0x30] sm:$0xff]  ;;  %v1207_v6 = vld [vmem:[%s381_s22 + $0x8] sm:$0xff]  ;;  %v1209_v7 = vld [vmem:[%s381_s22 + $0x18] sm:$0xff] }
  0x10   : > { %v404_v8 = vpack.c.bf16 %v1205_v5, %v1201_v3  ;;  %v403_v9 = vpack.c.bf16 %v1209_v7, %v1207_v6  ;;  %v1215_v10 = vld [vmem:[%s381_s22] sm:$0xff]  ;;  %v1217_v11 = vld [vmem:[%s381_s22 + $0x10] sm:$0xff]  ;;  %v595_v49 = vld [vmem:[%s1346_s4 + $0x8] sm:$0xff] }
  0x11   : > { %443 = vmatprep.subr.bf16.mxu0 %v405_v4  ;;  %v402_v12 = vpack.c.bf16 %v1217_v11, %v1215_v10  ;;  %v506_v41 = vld [vmem:[%s1345_s3] sm:$0xff]  ;;  %v597_v52 = vld [vmem:[%s1347_s5 + $0x8] sm:$0xff] }
  0x12   : > { %444 = vmatpush1.bf16.msra.mxu0 %v404_v8  ;;  %v596_v51 = vld [vmem:[%s1347_s5] sm:$0xff] }
  0x13   : > { %445 = vmatprep.subr.bf16.mxu0 %v403_v9 }
  0x16   : > { %446 = vmatpush1.bf16.msra.mxu0 %v402_v12 }
  0x19   : > { %1032 = vmatmul.mubr.msk.bf16.vlgmr.msra.gmra.mxu0 %vm421_vm0, %v1100_v13 }
  0x1a   : > { %473 = vmatprep.mubr.bf16.mxu0 %v1117_v0 }
  0x21   : > { %1033 = vmatmul.mubr.msk.bf16.gmra.mxu0 %vm421_vm0, %v1101_v14 }
  0x22   : > { %483 = vmatprep.mubr.bf16.mxu0 %v1117_v0 }
  0x29   : > { %1034 = vmatmul.mubr.msk.bf16.gmra.mxu0 %vm421_vm0, %v1102_v15 }
  0xd9   : > { %v465_v16 = vpop.f32.mrf.mxu0 }
  0xdb   : > { %v467_v17 = vpop.f32.mrf.mxu0 }
  0xdd   : > { %v1232_v18 = vpop.f32.mrf.mxu0 }
  0xdf   : > { %v1234_v19 = vpop.f32.mrf.mxu0 }
  0xe1   : > { %v475_v20 = vpop.f32.mrf.mxu0 }
  0xe3   : > { %v477_v21 = vpop.f32.mrf.mxu0 }
  0xe5   : > { %v479_v22 = vpop.f32.mrf.mxu0 }
  0xe7   : > { %v481_v23 = vpop.f32.mrf.mxu0 }
  0xe9   : > { %v485_v24 = vpop.f32.mrf.mxu0 }
  0xea   : > { %v494_v32 = vmul.f32 %v485_v24, %v475_v20 }
  0xeb   : > { %v487_v25 = vpop.f32.mrf.mxu0 }
  0xec   : > { %v495_v30 = vmul.f32 %v487_v25, %v477_v21  ;;  %v715_v21 = vld [vmem:[%s1349_s7] sm:$0xff] }
  0xed   : > { %v489_v26 = vpop.f32.mrf.mxu0 }
  0xee   : > { %v496_v28 = vmul.f32 %v489_v26, %v479_v22  ;;  %v498_v33 = vadd.f32 %v495_v30, %v494_v32  ;;  %v712_v22 = vld [vmem:[%s1348_s6 + $0x8] sm:$0xff] }
  0xef   : > { %v491_v27 = vpop.f32.mrf.mxu0 }
  0xf0   : > { %v497_v29 = vmul.f32 %v491_v27, %v481_v23 }
  0xf2   : > { %v501_v31 = vadd.f32 %v497_v29, %v496_v28  ;;  %v716_v28 = vld [vmem:[%s1349_s7 + $0x8] sm:$0xff] }
  0xf4   : > { %502 = vadd.xlane.f32.xlu0 %v501_v31 }
  0xf8   : > { %499 = vadd.xlane.f32.xlu0 %v498_v33 }
 0x17d   : > { %v503_v35 = vpop.xlane.xlu0 %502 }
 0x17e   : > { %1065 = vmatprep.subr.mxu1 %v503_v35 }
 0x17f   : > { %1066 = vmatpush3.msra.mxu1 %v503_v35 }
 0x181   : > { %v500_v36 = vpop.xlane.xlu0 %499 }
 0x182   : > { %1067 = vmatprep.subr.mxu1 %v500_v36 }
 0x183   : > { %1068 = vmatpush3.msra.mxu1 %v500_v36 }
 0x184   : > { %1070 = vmatmul.mubr.msk.f32.vlgmr.msra.gmra.mxu1 %vm508_vm1, %v505_v37 }
 0x185   : > { %1076 = vmatprep.mubr.msk.f32.mxu1 %vm508_vm1, %v594_v38 }
 0x244   : > { %v1071_v40 = vpop.f32.mrf.mxu1 }
 0x245   : > { %v587_v42 = vadd.f32 %v1071_v40, %v507_v39 }
 0x246   : > { %v581_v43 = vpop.f32.mrf.mxu1 }
 0x247   : > { %v591_v44 = vmax.f32 %v587_v42, 0.0  ;;  %v582_v45 = vadd.f32 %v581_v43, %v506_v41  ;;  %v750_v42 = vld [vmem:[%s1351_s9 + $0x8] sm:$0xff]  ;;  %v751_v43 = vld [vmem:[%s1351_s9 + $0x10] sm:$0xff] }
 0x249   : > { %v593_v46 = vadd.f32 %v591_v44, %v503_v35  ;;  %v590_v47 = vmax.f32 %v582_v45, 0.0  ;;  %v752_v44 = vld [vmem:[%s1351_s9 + $0x18] sm:$0xff] }
 0x24b   : > { %v592_v48 = vadd.f32 %v590_v47, %v500_v36  ;;  %1072 = vmatprep.subr.mxu1 %v593_v46 }
 0x24c   : > { %1073 = vmatpush3.msra.mxu1 %v593_v46 }
 0x24d   : > { %1074 = vmatprep.subr.mxu1 %v592_v48 }
 0x24e   : > { %1075 = vmatpush3.msra.mxu1 %v592_v48 }
 0x24f   : > { %1077 = vmatmul.mubr.msk.f32.vlgmr.msra.gmra.mxu1 %vm508_vm1, %v595_v49 }
 0x30f   : > { %v1078_v50 = vpop.f32.mrf.mxu1 }
 0x310   : > { %v676_v55 = vadd.f32 %v1078_v50, %v597_v52 }
 0x311   : > { %v670_v53 = vpop.f32.mrf.mxu1 }
 0x312   : > { %v671_v54 = vadd.f32 %v670_v53, %v596_v51  ;;  %v680_v57 = vmax.f32 %v676_v55, 0.0  ;;  %v1103_v53 = vld [vmem:[%s1350_s8] sm:$0xff]   ;;  %v853_v55 = vld [vmem:[%s1352_s10 + $0x8] sm:$0xff] }
 0x314   : > { %v679_v56 = vmax.f32 %v671_v54, 0.0  ;;  %v1104_v54 = vld [vmem:[%s1350_s8 + $0x8] sm:$0xff]  }
 0x316   : > { %683 = vperm.xlu1 %1098, %v679_v56  }
 0x31a   : > { %688 = vperm.xlu1 %1098, %v680_v57   ;;  %v852_v57 = vld [vmem:[%s1352_s10] sm:$0xff] }
 0x391   : > { %v684_v58 = vpop.permute.xlu1 %683 }
 0x392   : > { %v691_v59 = vmul.f32 %v684_v58, %v465_v16  ;;  %v692_v60 = vmul.f32 %v684_v58, %v467_v17  ;;  %v749_v16 = vld [vmem:[%s1351_s9] sm:$0xff] }
 0x393   : > { %1083 = vmatprep.mubr.msk.f32.mxu1 %vm508_vm1, %v749_v16  ;;  %v711_v17 = vld [vmem:[%s1348_s6] sm:$0xff] }
 0x394   : > { %v695_v61 = vadd.f32 %v692_v60, %v691_v59  ;;  %v701_v62 = vmul.f32 %v691_v59, %v691_v59  ;;  %v702_v63 = vmul.f32 %v692_v60, %v692_v60 }
 0x395   : > { %v689_v4 = vpop.permute.xlu1 %688 }
 0x396   : > { %v693_v8 = vmul.f32 %v689_v4, %v1232_v18  ;;  %v694_v9 = vmul.f32 %v689_v4, %v1234_v19  ;;  %696 = vadd.xlane.f32.xlu0 %v695_v61  ;;  %v705_v12 = vadd.f32 %v702_v63, %v701_v62  ;;  %v854_v62 = vld [vmem:[%s1352_s10 + $0x10] sm:$0xff] }
 0x398   : > { %v698_v13 = vadd.f32 %v694_v9, %v693_v8  ;;  %v703_v14 = vmul.f32 %v693_v8, %v693_v8  ;;  %v704_v15 = vmul.f32 %v694_v9, %v694_v9 }
 0x39a   : > { %706 = vadd.xlane.f32.xlu0 %v705_v12  ;;  %699 = vadd.xlane.f32.xlu1 %v698_v13  ;;  %v708_v20 = vadd.f32 %v704_v15, %v703_v14 }
 0x39e   : > { %709 = vadd.xlane.f32.xlu0 %v708_v20 }
 0x41f   : > { %v697_v18 = vpop.xlane.xlu0 %696 }
 0x420   : > { %v713_v19 = vmul.f32 %v711_v17, %v697_v18 }
 0x422   : > { %v719_v25 = vmul.f32 %v713_v19, %v713_v19 }
 0x423   : > { %v707_v23 = vpop.xlane.xlu0 %706  ;;  %v700_v24 = vpop.xlane.xlu1 %699 }
 0x424   : > { %v717_v26 = vmul.f32 %v715_v21, %v707_v23  ;;  %v714_v27 = vmul.f32 %v712_v22, %v700_v24 }
 0x426   : > { %v721_v29 = vsub.f32 %v717_v26, %v719_v25  ;;  %v720_v32 = vmul.f32 %v714_v27, %v714_v27 }
 0x427   : > { %v710_v30 = vpop.xlane.xlu0 %709 }
 0x428   : > { %v723_v31 = vmax.f32 %v721_v29, 0.0  ;;  %v718_v33 = vmul.f32 %v716_v28, %v710_v30 }
 0x42a   : > { %v725_v34 = vadd.f32 1e-05, %v723_v31  ;;  %v722_v35 = vsub.f32 %v718_v33, %v720_v32 }
 0x42c   : > { %1105 = vrsqrt.f32 %v725_v34  ;;  %v724_v36 = vmax.f32 %v722_v35, 0.0 }
 0x42e   : > { %v726_v37 = vadd.f32 1e-05, %v724_v36 }
 0x430   : > { %1107 = vrsqrt.f32 %v726_v37 }
 0x439   : > { %v1106_v38 = vpop.eup %1105 }
 0x43a   : > { %731 = vperm.xlu0 %1099, %v1106_v38   ;;  %v753_v41 = vmul.f32 %v1106_v38, %v713_v19 }
 0x43d   : > { %v1108_v39 = vpop.eup %1107 }
 0x43e   : > { %736 = vperm.xlu1 %1098, %v1108_v39   ;;  %v754_v40 = vmul.f32 %v1108_v39, %v714_v27 }
 0x440   : > { %1079 = vmatprep.subr.mxu1 %v754_v40 }
 0x441   : > { %1080 = vmatpush3.msra.mxu1 %v754_v40 }
 0x442   : > { %1081 = vmatprep.subr.mxu1 %v753_v41 }
 0x443   : > { %1082 = vmatpush3.msra.mxu1 %v753_v41 }
 0x444   : > { %1084 = vmatmul.mubr.msk.f32.vlgmr.msra.gmra.mxu1 %vm508_vm1, %v750_v42 }
 0x445   : > { %1086 = vmatprep.mubr.msk.f32.mxu1 %vm508_vm1, %v751_v43 }
 0x448   : > { %1087 = vmatmul.mubr.msk.f32.gmra.mxu1 %vm508_vm1, %v752_v44 }
 0x449   : > { %928 = vmatprep.mubr.bf16.mxu1 %v1117_v0 }
 0x4b5   : > { %v732_v45 = vpop.permute.xlu0 %731 }
 0x4b6   : > { %v739_v47 = vmul.f32 %v732_v45, %v691_v59  ;;  %v740_v48 = vmul.f32 %v732_v45, %v692_v60 }
 0x4b9   : > { %v737_v46 = vpop.permute.xlu1 %736 }
 0x4ba   : > { %v741_v49 = vmul.f32 %v737_v46, %v693_v8  ;;  %v742_v50 = vmul.f32 %v737_v46, %v694_v9 }
 0x4bc   : > { %v743_v51 = vpack.c.bf16 %v741_v49, %v739_v47  ;;  %v744_v52 = vpack.c.bf16 %v742_v50, %v740_v48 }
 0x4be   : > { %910 = vmatprep.subr.bf16.mxu1 %v744_v52 }
 0x4bf   : > { %911 = vmatpush1.bf16.msra.mxu1 %v743_v51 }
 0x4c2   : > { %1045 = vmatmul.mubr.msk.bf16.vlgmr.msra.gmra.mxu1 %vm508_vm1, %v1103_v53 }
 0x4c3   : > { %938 = vmatprep.mubr.bf16.mxu1 %v1117_v0  ;;  %v855_v0 = vld [vmem:[%s1352_s10 + $0x18] sm:$0xff] }
 0x4ca   : > { %1046 = vmatmul.mubr.msk.bf16.gmra.mxu1 %vm508_vm1, %v1104_v54 }
 0x504   : > { %v1085_v56 = vpop.f32.mrf.mxu1 }
 0x505   : > { %v857_v58 = vsub.f32 %v853_v55, %v1085_v56 }
 0x506   : > { %v833_v59 = vpop.f32.mrf.mxu1 }
 0x507   : > { %v856_v60 = vsub.f32 %v852_v57, %v833_v59  ;;  %867 = vperm.xlu0 %1099, %v857_v58  }
 0x508   : > { %v1088_v61 = vpop.f32.mrf.mxu1 }
 0x509   : > { %v859_v63 = vsub.f32 %v855_v0, %v1088_v61  ;;  %862 = vperm.xlu1 %1098, %v856_v60  }
 0x50a   : > { %v843_v4 = vpop.f32.mrf.mxu1 }
 0x50b   : > { %v858_v8 = vsub.f32 %v854_v62, %v843_v4  ;;  %877 = vperm.xlu0 %1099, %v859_v63  }
 0x50d   : > { %872 = vperm.xlu1 %1098, %v858_v8  }
 0x582   : > { %v930_v9 = vpop.f32.mrf.mxu1  ;;  %v868_v20 = vpop.permute.xlu0 %867 }
 0x584   : > { %v863_v12 = vpop.permute.xlu1 %862  ;;  %v932_v13 = vpop.f32.mrf.mxu1 }
 0x585   : > { %v931_v14 = vadd.f32 %v930_v9, %v863_v12  ;;  %v933_v15 = vadd.f32 %v932_v13, %v863_v12 }
 0x586   : > { %v934_v16 = vpop.f32.mrf.mxu1  ;;  %v878_v29 = vpop.permute.xlu0 %877 }
 0x587   : > { %v949_v17 = vadd.f32 %v931_v14, %v1215_v10  ;;  %v950_v18 = vadd.f32 %v933_v15, %v1207_v6  ;;  %v935_v19 = vadd.f32 %v934_v16, %v868_v20 }
 0x588   : > { %v936_v21 = vpop.f32.mrf.mxu1  ;;  %v873_v24 = vpop.permute.xlu1 %872 }
 0x589   : > { %957 = vst [vmem:[%s1321_s27] sm:$0xff] %v949_v17  ;;  %958 = vst [vmem:[%s1321_s27 + $0x8] sm:$0xff] %v950_v18  ;;  %v951_v22 = vadd.f32 %v935_v19, %v1217_v11  ;;  %v937_v23 = vadd.f32 %v936_v21, %v868_v20 }
 0x58a   : > { %v940_v25 = vpop.f32.mrf.mxu1 }
 0x58b   : > { %959 = vst [vmem:[%s1321_s27 + $0x10] sm:$0xff] %v951_v22  ;;  %v952_v26 = vadd.f32 %v937_v23, %v1209_v7  ;;  %v941_v27 = vadd.f32 %v940_v25, %v873_v24 }
 0x58c   : > { %v942_v10 = vpop.f32.mrf.mxu1 }
 0x58d   : > { %960 = vst [vmem:[%s1321_s27 + $0x18] sm:$0xff] %v952_v26  ;;  %v953_v6 = vadd.f32 %v941_v27, %v1201_v3  ;;  %v943_v28 = vadd.f32 %v942_v10, %v873_v24 }
 0x58e   : > { %v944_v30 = vpop.f32.mrf.mxu1 }
 0x58f   : > { %961 = vst [vmem:[%s1321_s27 + $0x20] sm:$0xff] %v953_v6  ;;  %v954_v11 = vadd.f32 %v943_v28, %v1197_v1  ;;  %v945_v31 = vadd.f32 %v944_v30, %v878_v29 }
 0x590   : > { %v946_v32 = vpop.f32.mrf.mxu1 }
 0x591   : > { %962 = vst [vmem:[%s1321_s27 + $0x28] sm:$0xff] %v954_v11  ;;  %v955_v33 = vadd.f32 %v945_v31, %v1205_v5  ;;  %v947_v34 = vadd.f32 %v946_v32, %v878_v29 }
 0x593   : > { %963 = vst [vmem:[%s1321_s27 + $0x30] sm:$0xff] %v955_v33  ;;  %v956_v7 = vadd.f32 %v947_v34, %v1199_v2 }
 0x595   : > { %964 = vst [vmem:[%s1321_s27 + $0x38] sm:$0xff] %v956_v7 }
 0x596 PF: > { %s21_s17 = sadd.s32 1, %s1115_s17  }
 0x597   : > { %p18_p4 = scmp.ge.s32.totalorder %s21_s17, 4  }
 0x599   :  { %20 = sbr.rel (!%p18_p4) target bundleno = 1 (0x1), region = 94 }

</bundles_post_ra>
